<compile_context>
chip_gen: v7x
topology: tpu7x:2x2x1
jax: 0.10.0
libtpu: 0.0.40
codegen_flags: <defaults>
</compile_context>

<pallas_src>
import functools

import jax
import jax.numpy as jnp
from jax.experimental import pallas as pl
from jax.experimental.pallas import tpu as pltpu


def _round_up(n, m):
    return ((n + m - 1) // m) * m


def mlp_kernel(x_ref, w1_ref, b1_ref, w2_ref, b2_ref, w3_ref, b3_ref, o_ref):
    """Fused 3-layer MLP forward on one (TB, K) batch tile.

    All three layers use jnp.dot (MXU); K=3 for layer 1 is fine — the layers
    are serially dependent inside a grid step so there is nothing to overlap,
    and this keeps lane slices / broadcasts off the critical path.
    """
    x = x_ref[...]                                                   # (TB, K)  f32
    h1 = jnp.dot(x, w1_ref[...], preferred_element_type=jnp.float32) + b1_ref[...]
    h1 = jnp.maximum(h1, 0.0)

    h2 = jnp.dot(h1, w2_ref[...], preferred_element_type=jnp.float32) + b2_ref[...]
    h2 = jnp.maximum(h2, 0.0)

    out = jnp.dot(h2, w3_ref[...], preferred_element_type=jnp.float32) + b3_ref[...]
    o_ref[...] = out.astype(o_ref.dtype)


@functools.partial(jax.jit, static_argnames=("batch_tile",))
def pentest_policy_forward(x, w1, b1, w2, b2, w3, b3, *, batch_tile=2048):
    B, input_dim = x.shape
    hidden1 = w1.shape[1]
    hidden2 = w2.shape[1]
    output_dim = w3.shape[1]

    # Accept PyTorch-style 1-D biases or (1, out) biases.
    b1 = jnp.reshape(b1, (1, hidden1))
    b2 = jnp.reshape(b2, (1, hidden2))
    b3 = jnp.reshape(b3, (1, output_dim))

    # --- Lane-dense output: pad fc3 to a multiple of 128 output columns so the
    # output write is a full-width (unmasked) store; extra columns are exact
    # zeros (zero weights, zero bias) and are sliced off after the kernel.
    out_pad = _round_up(output_dim, 128)
    if out_pad != output_dim:
        w3 = jnp.pad(w3, ((0, 0), (0, out_pad - output_dim)))
        b3 = jnp.pad(b3, ((0, 0), (0, out_pad - output_dim)))

    # --- Batch tiling: large MXU-friendly tiles to amortize per-grid-step
    # overhead; pad the batch tail instead of asserting divisibility.  Cap the
    # tile at ceil(B/2) (8-aligned) so the grid has >= 2 steps whenever the
    # batch is splittable — on v7x that keeps both TensorCores busy via
    # dimension_semantics=("parallel",).
    half = max(8, _round_up((B + 1) // 2, 8))
    tb = min(batch_tile, half)
    b_padded = _round_up(B, tb)
    if b_padded != B:
        x = jnp.pad(x, ((0, b_padded - B), (0, 0)))

    grid = (b_padded // tb,)

    # Per-step VMEM footprint estimate: double-buffered x/out tiles + the
    # (constant-index, but conservatively double-buffered) weights/biases.
    vmem_bytes = 4 * (
        2 * tb * input_dim + 2 * tb * out_pad
        + 2 * (input_dim * hidden1 + hidden1
               + hidden1 * hidden2 + hidden2
               + hidden2 * out_pad + out_pad)
    )
    cp_kwargs = {}
    if vmem_bytes > 12 * 1024 * 1024:  # approaching v5e's 16 MiB scoped default
        cp_kwargs["vmem_limit_bytes"] = int(min(2 * vmem_bytes, 48 * 1024 * 1024))

    out = pl.pallas_call(
        mlp_kernel,
        out_shape=jax.ShapeDtypeStruct((b_padded, out_pad), jnp.float32),
        grid_spec=pltpu.PrefetchScalarGridSpec(
            num_scalar_prefetch=0,
            grid=grid,
            in_specs=[
                # x: tiled along batch
                pl.BlockSpec((tb, input_dim), lambda i: (i, 0)),
                # weights / biases: fully resident, same block every grid step
                pl.BlockSpec((input_dim, hidden1), lambda i: (0, 0)),
                pl.BlockSpec((1, hidden1), lambda i: (0, 0)),
                pl.BlockSpec((hidden1, hidden2), lambda i: (0, 0)),
                pl.BlockSpec((1, hidden2), lambda i: (0, 0)),
                pl.BlockSpec((hidden2, out_pad), lambda i: (0, 0)),
                pl.BlockSpec((1, out_pad), lambda i: (0, 0)),
            ],
            out_specs=pl.BlockSpec((tb, out_pad), lambda i: (i, 0)),
        ),
        compiler_params=pltpu.CompilerParams(
            dimension_semantics=("parallel",),
            **cp_kwargs,
        ),
    )(x, w1, b1, w2, b2, w3, b3)

    return out[:B, :output_dim]


def init_params(key, input_dim=3, hidden_dim1=128, hidden_dim2=128, output_dim=4):
    """Deterministic PyTorch-style (Kaiming-uniform-ish) init; weights stored (in, out)."""
    ks = jax.random.split(key, 6)

    def linear_init(kw, kb, fan_in, fan_out):
        bound = 1.0 / jnp.sqrt(fan_in)
        w = jax.random.uniform(kw, (fan_in, fan_out), jnp.float32, -bound, bound)
        b = jax.random.uniform(kb, (fan_out,), jnp.float32, -bound, bound)
        return w, b

    w1, b1 = linear_init(ks[0], ks[1], input_dim, hidden_dim1)
    w2, b2 = linear_init(ks[2], ks[3], hidden_dim1, hidden_dim2)
    w3, b3 = linear_init(ks[4], ks[5], hidden_dim2, output_dim)
    return w1, b1, w2, b2, w3, b3


def reference_forward(x, w1, b1, w2, b2, w3, b3):
    h1 = jnp.maximum(x @ w1 + b1, 0.0)
    h2 = jnp.maximum(h1 @ w2 + b2, 0.0)
    return h2 @ w3 + b3


if __name__ == "__main__":
    key = jax.random.PRNGKey(0)
    k_x, k_x2, k_p = jax.random.split(key, 3)

    input_dim, output_dim = 3, 4
    params = init_params(k_p, input_dim=input_dim, hidden_dim1=128,
                         hidden_dim2=128, output_dim=output_dim)

    # Small, even batch (tile split into two 8-row grid steps).
    batch = 16
    x = jax.random.normal(k_x, (batch, input_dim), dtype=jnp.float32)
    out = jax.block_until_ready(pentest_policy_forward(x, *params))
    ref = reference_forward(x, *params)
    assert out.shape == (batch, output_dim), out.shape
    assert jnp.allclose(out, ref, atol=1e-5, rtol=1e-5), "mismatch vs reference"

    # Odd batch exercises the padded-tail path.
    batch2 = 37
    x2 = jax.random.normal(k_x2, (batch2, input_dim), dtype=jnp.float32)
    out2 = jax.block_until_ready(pentest_policy_forward(x2, *params))
    ref2 = reference_forward(x2, *params)
    assert out2.shape == (batch2, output_dim), out2.shape
    assert jnp.allclose(out2, ref2, atol=1e-5, rtol=1e-5), "mismatch vs reference (odd batch)"

    print("KERNEL_OK")
</pallas_src>

<mosaic_0001>
module attributes {stable_mosaic.version = 11 : i64} {
  func.func @mlp_kernel(%arg0: i32, %arg1: memref<8x3xf32, #tpu.memory_space<vmem>>, %arg2: memref<3x128xf32, #tpu.memory_space<vmem>>, %arg3: memref<1x128xf32, #tpu.memory_space<vmem>>, %arg4: memref<128x128xf32, #tpu.memory_space<vmem>>, %arg5: memref<1x128xf32, #tpu.memory_space<vmem>>, %arg6: memref<128x128xf32, #tpu.memory_space<vmem>>, %arg7: memref<1x128xf32, #tpu.memory_space<vmem>>, %arg8: memref<8x128xf32, #tpu.memory_space<vmem>>) attributes {dimension_semantics = [#tpu.dimension_semantics<parallel>], iteration_bounds = array<i64: 2>, scalar_prefetch = 0 : i64, scratch_operands = 0 : i64, tpu.core_type = #tpu.core_type<tc>, window_params = [{transform_indices = @transform_0, window_bounds = array<i64: 8, 3>}, {pipeline_mode = #tpu.pipeline_mode<synchronous>, transform_indices = @transform_1, window_bounds = array<i64: 3, 128>}, {pipeline_mode = #tpu.pipeline_mode<synchronous>, transform_indices = @transform_2, window_bounds = array<i64: 1, 128>}, {pipeline_mode = #tpu.pipeline_mode<synchronous>, transform_indices = @transform_3, window_bounds = array<i64: 128, 128>}, {pipeline_mode = #tpu.pipeline_mode<synchronous>, transform_indices = @transform_4, window_bounds = array<i64: 1, 128>}, {pipeline_mode = #tpu.pipeline_mode<synchronous>, transform_indices = @transform_5, window_bounds = array<i64: 128, 128>}, {pipeline_mode = #tpu.pipeline_mode<synchronous>, transform_indices = @transform_6, window_bounds = array<i64: 1, 128>}, {transform_indices = @transform_7, window_bounds = array<i64: 8, 128>}]} {
    %c0 = arith.constant 0 : index
    %c0_0 = arith.constant 0 : index
    %0 = vector.load %arg1[%c0, %c0_0] : memref<8x3xf32, #tpu.memory_space<vmem>>, vector<8x3xf32>
    %c0_1 = arith.constant 0 : index
    %c0_2 = arith.constant 0 : index
    %1 = vector.load %arg2[%c0_1, %c0_2] : memref<3x128xf32, #tpu.memory_space<vmem>>, vector<3x128xf32>
    %cst = arith.constant dense<0.000000e+00> : vector<8x128xf32>
    %2 = tpu.matmul %0, %1, %cst {dimension_numbers = #tpu.dot_dimension_numbers<[1], [0], [0], [1], [0, 0, 1, 1], [], []>} : vector<8x3xf32>, vector<3x128xf32>, vector<8x128xf32> -> vector<8x128xf32>
    %c0_3 = arith.constant 0 : index
    %c0_4 = arith.constant 0 : index
    %3 = vector.load %arg3[%c0_3, %c0_4] : memref<1x128xf32, #tpu.memory_space<vmem>>, vector<1x128xf32>
    %4 = vector.broadcast %3 : vector<1x128xf32> to vector<8x128xf32>
    %5 = arith.addf %2, %4 : vector<8x128xf32>
    %cst_5 = arith.constant 0.000000e+00 : f32
    %6 = vector.broadcast %cst_5 : f32 to vector<8x128xf32>
    %7 = arith.maximumf %5, %6 : vector<8x128xf32>
    %c0_6 = arith.constant 0 : index
    %c0_7 = arith.constant 0 : index
    %8 = vector.load %arg4[%c0_6, %c0_7] : memref<128x128xf32, #tpu.memory_space<vmem>>, vector<128x128xf32>
    %cst_8 = arith.constant dense<0.000000e+00> : vector<8x128xf32>
    %9 = tpu.matmul %7, %8, %cst_8 {dimension_numbers = #tpu.dot_dimension_numbers<[1], [0], [0], [1], [0, 0, 1, 1], [], []>} : vector<8x128xf32>, vector<128x128xf32>, vector<8x128xf32> -> vector<8x128xf32>
    %c0_9 = arith.constant 0 : index
    %c0_10 = arith.constant 0 : index
    %10 = vector.load %arg5[%c0_9, %c0_10] : memref<1x128xf32, #tpu.memory_space<vmem>>, vector<1x128xf32>
    %11 = vector.broadcast %10 : vector<1x128xf32> to vector<8x128xf32>
    %12 = arith.addf %9, %11 : vector<8x128xf32>
    %cst_11 = arith.constant 0.000000e+00 : f32
    %13 = vector.broadcast %cst_11 : f32 to vector<8x128xf32>
    %14 = arith.maximumf %12, %13 : vector<8x128xf32>
    %c0_12 = arith.constant 0 : index
    %c0_13 = arith.constant 0 : index
    %15 = vector.load %arg6[%c0_12, %c0_13] : memref<128x128xf32, #tpu.memory_space<vmem>>, vector<128x128xf32>
    %cst_14 = arith.constant dense<0.000000e+00> : vector<8x128xf32>
    %16 = tpu.matmul %14, %15, %cst_14 {dimension_numbers = #tpu.dot_dimension_numbers<[1], [0], [0], [1], [0, 0, 1, 1], [], []>} : vector<8x128xf32>, vector<128x128xf32>, vector<8x128xf32> -> vector<8x128xf32>
    %c0_15 = arith.constant 0 : index
    %c0_16 = arith.constant 0 : index
    %17 = vector.load %arg7[%c0_15, %c0_16] : memref<1x128xf32, #tpu.memory_space<vmem>>, vector<1x128xf32>
    %18 = vector.broadcast %17 : vector<1x128xf32> to vector<8x128xf32>
    %19 = arith.addf %16, %18 : vector<8x128xf32>
    %c0_17 = arith.constant 0 : index
    %c0_18 = arith.constant 0 : index
    %20 = vector.load %arg8[%c0_17, %c0_18] : memref<8x128xf32, #tpu.memory_space<vmem>>, vector<8x128xf32>
    tpu.vector_store %arg8[%c0_17, %c0_18], %19 {strides = array<i32>} : memref<8x128xf32, #tpu.memory_space<vmem>>, vector<8x128xf32>,
    return
  }
  func.func @transform_0(%arg0: i32) -> (i32, i32) {
    %c0_i32 = arith.constant 0 : i32
    %c0_i32_0 = arith.constant 0 : i32
    return %arg0, %c0_i32 : i32, i32
  }
  func.func @transform_1(%arg0: i32) -> (i32, i32) {
    %c0_i32 = arith.constant 0 : i32
    %c0_i32_0 = arith.constant 0 : i32
    %c0_i32_1 = arith.constant 0 : i32
    return %c0_i32, %c0_i32_0 : i32, i32
  }
  func.func @transform_2(%arg0: i32) -> (i32, i32) {
    %c0_i32 = arith.constant 0 : i32
    %c0_i32_0 = arith.constant 0 : i32
    %c0_i32_1 = arith.constant 0 : i32
    return %c0_i32, %c0_i32_0 : i32, i32
  }
  func.func @transform_3(%arg0: i32) -> (i32, i32) {
    %c0_i32 = arith.constant 0 : i32
    %c0_i32_0 = arith.constant 0 : i32
    %c0_i32_1 = arith.constant 0 : i32
    return %c0_i32, %c0_i32_0 : i32, i32
  }
  func.func @transform_4(%arg0: i32) -> (i32, i32) {
    %c0_i32 = arith.constant 0 : i32
    %c0_i32_0 = arith.constant 0 : i32
    %c0_i32_1 = arith.constant 0 : i32
    return %c0_i32, %c0_i32_0 : i32, i32
  }
  func.func @transform_5(%arg0: i32) -> (i32, i32) {
    %c0_i32 = arith.constant 0 : i32
    %c0_i32_0 = arith.constant 0 : i32
    %c0_i32_1 = arith.constant 0 : i32
    return %c0_i32, %c0_i32_0 : i32, i32
  }
  func.func @transform_6(%arg0: i32) -> (i32, i32) {
    %c0_i32 = arith.constant 0 : i32
    %c0_i32_0 = arith.constant 0 : i32
    %c0_i32_1 = arith.constant 0 : i32
    return %c0_i32, %c0_i32_0 : i32, i32
  }
  func.func @transform_7(%arg0: i32) -> (i32, i32) {
    %c0_i32 = arith.constant 0 : i32
    %c0_i32_0 = arith.constant 0 : i32
    return %arg0, %c0_i32 : i32, i32
  }
}

</mosaic_0001>

<bundles_post_ra>
// kernel: pentest_policy_forward.1
= control target key start
LH: loop header
LB: loop body
LE: loop exit
PB: predicated region body
PF: predicated region fallthrough
CT: control target
= control target key end

     0   :  { %s838_s24 = smov 0   ;;  %s989_s0 = inlined_call_operand.vmem [shape: f32[16,3], index: 0, kind: input, shape index: {}]   ;;  %s990_s1 = inlined_call_operand.vmem [shape: f32[3,128], index: 1, kind: input, shape index: {}]   ;;  %s991_s2 = inlined_call_operand.vmem [shape: f32[1,128], index: 2, kind: input, shape index: {}]   ;;  %s992_s3 = inlined_call_operand.vmem [shape: f32[128,128], index: 3, kind: input, shape index: {}]   ;;  %s993_s4 = inlined_call_operand.vmem [shape: f32[1,128], index: 4, kind: input, shape index: {}]   ;;  %s994_s5 = inlined_call_operand.vmem [shape: f32[128,128], index: 5, kind: input, shape index: {}]   ;;  %s995_s6 = inlined_call_operand.vmem [shape: f32[1,128], index: 6, kind: input, shape index: {}]   ;;  %s996_s7 = inlined_call_operand.vmem [shape: f32[16,128], index: 7, kind: output, shape index: {}]  }
   0x1 LB: > { %s603_s25 = sadd.s32 4294967295, %s793_s24   ;;  %p607_p0 = scmp.ge.s32.totalorder %s793_s24, 1  ;;  %s793_s24 = sphi %s838_s24, %s17_s24  }
   0x2   : > { %p236_p1 = scmp.lt.s32.totalorder %s793_s24, 3 }
   0x4   : > { %p237_p2 = pnand %p607_p0, %p236_p1 }
   0x5   : > { %v275_v0 = vld [vmem:[%s990_s1] sm:$0x7] (!%p237_p2)  ;;  %vm287_vm0 = vcmask (!%p237_p2), 1042432   ;;  %p266_p3 = scmp.lt.s32.totalorder (!%p237_p2), %s603_s25, 1  ;;  %v795_v1 = vmov (!%p237_p2), 0.0   ;;  %vm796_vm1 = vmmov (!%p237_p2), 0  }
   0x6   : > { %240 = sbr.rel (%p237_p2) target bundleno = 664 (0x298), region = 48  ;;  %653 = vmatprep.subr.mxu0 (!%p237_p2), %v795_v1  ;;  %655 = vmatprep.mubr.msk.f32.mxu0 (!%p237_p2), %vm796_vm1, %v795_v1  ;;  %v362_v2 = vld [vmem:[%s992_s3] sm:$0xff] (!%p237_p2)  ;;  %v363_v3 = vld [vmem:[%s992_s3 + $0x8] sm:$0xff] (!%p237_p2)  ;;  %v364_v4 = vld [vmem:[%s992_s3 + $0x10] sm:$0xff] (!%p237_p2)  ;;  %v797_v5 = vmov (!%p237_p2), 0.0|0.0   ;;  %vm283_vm2 = vcmask (!%p237_p2), 23552  }
   0x7   : > { %654 = vmatpush3.msk.msra.mxu0 (!%p237_p2), %vm287_vm0, %v275_v0  ;;  %728 = vmatprep.subr.bf16.mxu1 (!%p237_p2), %v797_v5  ;;  %v729_v6 = vpack.c.bf16 (!%p237_p2), %v363_v3, %v362_v2  ;;  %v365_v7 = vld [vmem:[%s992_s3 + $0x18] sm:$0xff] (!%p237_p2)  ;;  %v366_v9 = vld [vmem:[%s992_s3 + $0x20] sm:$0xff] (!%p237_p2)  ;;  %v367_v10 = vld [vmem:[%s992_s3 + $0x28] sm:$0xff] (!%p237_p2) }
   0x8   : > { %690 = vmatprep.mubr.msk.f32.mxu1 (!%p237_p2), %vm796_vm1, %v795_v1  ;;  %752 = vmatprep.subr.bf16.mxu0 (!%p237_p2), %v797_v5  ;;  %v732_v8 = vpack.c.bf16 (!%p237_p2), %v365_v7, %v364_v4  ;;  %v735_v12 = vpack.c.bf16 (!%p237_p2), %v367_v10, %v366_v9  ;;  %v368_v13 = vld [vmem:[%s992_s3 + $0x30] sm:$0xff] (!%p237_p2)  ;;  %v369_v14 = vld [vmem:[%s992_s3 + $0x38] sm:$0xff] (!%p237_p2)  ;;  %v370_v16 = vld [vmem:[%s992_s3 + $0x40] sm:$0xff] (!%p237_p2) }
   0x9   : > { %730 = vmatpush3.bf16.msra.mxu1 (!%p237_p2), %v729_v6  ;;  %v738_v15 = vpack.c.bf16 (!%p237_p2), %v369_v14, %v368_v13  ;;  %v371_v17 = vld [vmem:[%s992_s3 + $0x48] sm:$0xff] (!%p237_p2)  ;;  %v372_v19 = vld [vmem:[%s992_s3 + $0x50] sm:$0xff] (!%p237_p2)  ;;  %v373_v20 = vld [vmem:[%s992_s3 + $0x58] sm:$0xff] (!%p237_p2) }
   0xa   : > { %731 = vmatprep.subr.bf16.mxu1 (!%p237_p2), %v797_v5  ;;  %v741_v18 = vpack.c.bf16 (!%p237_p2), %v371_v17, %v370_v16  ;;  %v744_v21 = vpack.c.bf16 (!%p237_p2), %v373_v20, %v372_v19  ;;  %v374_v22 = vld [vmem:[%s992_s3 + $0x60] sm:$0xff] (!%p237_p2)  ;;  %v375_v23 = vld [vmem:[%s992_s3 + $0x68] sm:$0xff] (!%p237_p2)  ;;  %v376_v25 = vld [vmem:[%s992_s3 + $0x70] sm:$0xff] (!%p237_p2) }
   0xb   : > { %v747_v24 = vpack.c.bf16 (!%p237_p2), %v375_v23, %v374_v22  ;;  %v377_v26 = vld [vmem:[%s992_s3 + $0x78] sm:$0xff] (!%p237_p2)  ;;  %v456_v28 = vld [vmem:[%s994_s5] sm:$0xff] (!%p237_p2)  ;;  %v457_v29 = vld [vmem:[%s994_s5 + $0x8] sm:$0xff] (!%p237_p2) }
   0xc   : > { %v750_v27 = vpack.c.bf16 (!%p237_p2), %v377_v26, %v376_v25  ;;  %v458_v30 = vld [vmem:[%s994_s5 + $0x10] sm:$0xff] (!%p237_p2)  ;;  %v753_v31 = vpack.c.bf16 (!%p237_p2), %v457_v29, %v456_v28  ;;  %v459_v32 = vld [vmem:[%s994_s5 + $0x18] sm:$0xff] (!%p237_p2)  ;;  %v460_v34 = vld [vmem:[%s994_s5 + $0x20] sm:$0xff] (!%p237_p2) }
   0xd   : > { %s998_s25 = smov (!%p266_p3, %s603_s25), 1  ;;  %733 = vmatpush3.bf16.msra.mxu1 %v732_v8  ;;  %v756_v33 = vpack.c.bf16 %v459_v32, %v458_v30  ;;  %v461_v35 = vld [vmem:[%s994_s5 + $0x28] sm:$0xff]  ;;  %v462_v37 = vld [vmem:[%s994_s5 + $0x30] sm:$0xff]  ;;  %v463_v38 = vld [vmem:[%s994_s5 + $0x38] sm:$0xff] }
   0xe   : > { %s608_s13 = sshll.u32 %s998_s25, 3  ;;  %734 = vmatprep.subr.bf16.mxu1 %v797_v5  ;;  %v759_v36 = vpack.c.bf16 %v461_v35, %v460_v34  ;;  %v762_v39 = vpack.c.bf16 %v463_v38, %v462_v37  ;;  %v464_v40 = vld [vmem:[%s994_s5 + $0x40] sm:$0xff]  ;;  %v465_v41 = vld [vmem:[%s994_s5 + $0x48] sm:$0xff]  ;;  %v466_v43 = vld [vmem:[%s994_s5 + $0x50] sm:$0xff] }
   0xf   : > { %s269_s16 = scalar_lea.vmem %s989_s0, %s608_s13  ;;  %v765_v42 = vpack.c.bf16 %v465_v41, %v464_v40  ;;  %v467_v44 = vld [vmem:[%s994_s5 + $0x58] sm:$0xff]  ;;  %v468_v46 = vld [vmem:[%s994_s5 + $0x60] sm:$0xff]  ;;  %v469_v47 = vld [vmem:[%s994_s5 + $0x68] sm:$0xff]  ;;  %s273_s21 = scalar_lea.vmem %s996_s7, %s608_s13 }
  0x10   : > { %v274_v11 = vld [vmem:[%s269_s16] sm:$0xff]  ;;  %v768_v45 = vpack.c.bf16 %v467_v44, %v466_v43  ;;  %v771_v48 = vpack.c.bf16 %v469_v47, %v468_v46  ;;  %v470_v54 = vld [vmem:[%s994_s5 + $0x70] sm:$0xff]  ;;  %v471_v55 = vld [vmem:[%s994_s5 + $0x78] sm:$0xff] }
  0x11   : > { %656 = vmatmul.mubr.msk.f32.vlgmr.msra.gmra.mrb[0].mxu0 %vm283_vm2, %v274_v11  ;;  %736 = vmatpush3.bf16.msra.mxu1 %v735_v12  ;;  %v610_v49 = vld [vmem:[%s991_s2] ss:$0 sm:$0xff]  ;;  %v774_v56 = vpack.c.bf16 %v471_v55, %v470_v54 }
  0x12   : > { %725 = vmatprep.mubr.msk.f32.mxu0 %vm796_vm1, %v795_v1  ;;  %737 = vmatprep.subr.bf16.mxu1 %v797_v5  ;;  %v613_v57 = vld [vmem:[%s993_s4] ss:$0 sm:$0xff] }
  0x13   : > { %754 = vmatpush3.bf16.msra.mxu0 %v753_v31  ;;  %v614_v62 = vld [vmem:[%s995_s6] ss:$0 sm:$0xff] }
  0x14   : > { %755 = vmatprep.subr.bf16.mxu0 %v797_v5 }
  0x15   : > { %739 = vmatpush3.bf16.msra.mxu1 %v738_v15 }
  0x16   : > { %740 = vmatprep.subr.bf16.mxu1 %v797_v5 }
  0x17   : > { %757 = vmatpush3.bf16.msra.mxu0 %v756_v33 }
  0x18   : > { %758 = vmatprep.subr.bf16.mxu0 %v797_v5 }
  0x19   : > { %742 = vmatpush3.bf16.msra.mxu1 %v741_v18 }
  0x1a   : > { %743 = vmatprep.subr.bf16.mxu1 %v797_v5 }
  0x1b   : > { %760 = vmatpush3.bf16.msra.mxu0 %v759_v36 }
  0x1c   : > { %761 = vmatprep.subr.bf16.mxu0 %v797_v5 }
  0x1d   : > { %745 = vmatpush3.bf16.msra.mxu1 %v744_v21 }
  0x1e   : > { %746 = vmatprep.subr.bf16.mxu1 %v797_v5 }
  0x1f   : > { %763 = vmatpush3.bf16.msra.mxu0 %v762_v39 }
  0x20   : > { %764 = vmatprep.subr.bf16.mxu0 %v797_v5 }
  0x21   : > { %748 = vmatpush3.bf16.msra.mxu1 %v747_v24 }
  0x22   : > { %749 = vmatprep.subr.bf16.mxu1 %v797_v5 }
  0x23   : > { %766 = vmatpush3.bf16.msra.mxu0 %v765_v42 }
  0x24   : > { %767 = vmatprep.subr.bf16.mxu0 %v797_v5 }
  0x25   : > { %751 = vmatpush3.bf16.msra.mxu1 %v750_v27 }
  0x27   : > { %769 = vmatpush3.bf16.msra.mxu0 %v768_v45 }
  0x28   : > { %770 = vmatprep.subr.bf16.mxu0 %v797_v5 }
  0x2b   : > { %772 = vmatpush3.bf16.msra.mxu0 %v771_v48 }
  0x2c   : > { %773 = vmatprep.subr.bf16.mxu0 %v797_v5 }
  0x2f   : > { %775 = vmatpush3.bf16.msra.mxu0 %v774_v56 }
  0xe4   : > { %v357_v50 = vpop.f32.mrb[0].mxu0 }
  0xe5   : > { %v358_v51 = vadd.f32 %v610_v49, %v357_v50  ;;  %v657_v52 = vpop.f32.mrb[1].mxu0 }
  0xe7   : > { %v361_v53 = vmax.f32 %v358_v51, 0.0 }
  0xe9   : > { %691 = vmatmul.mubr.f32.vlgmr.msra.gmra.mrb[0].mxu1 %v361_v53 }
 0x1bc   : > { %v451_v58 = vpop.f32.mrb[0].mxu1 }
 0x1bd   : > { %v452_v59 = vadd.f32 %v613_v57, %v451_v58  ;;  %v692_v60 = vpop.f32.mrb[1].mxu1 }
 0x1bf   : > { %v455_v61 = vmax.f32 %v452_v59, 0.0 }
 0x1c1   : > { %726 = vmatmul.mubr.f32.vlgmr.msra.gmra.mrb[2].mxu0 %v455_v61 }
 0x294   : > { %v545_v63 = vpop.f32.mrb[2].mxu0 }
 0x295   : > { %v546_v0 = vadd.f32 %v614_v62, %v545_v63  ;;  %v727_v1 = vpop.f32.mrb[3].mxu0 }
 0x297   : > { %549 = vst [vmem:[%s273_s21] sm:$0xff] %v546_v0 }
 0x298 PF: > { %s17_s24 = sadd.s32 1, %s793_s24  }
 0x299   : > { %p14_p4 = scmp.ge.s32.totalorder %s17_s24, 4  }
 0x29b   :  { %16 = sbr.rel (!%p14_p4) target bundleno = 1 (0x1), region = 78 }

</bundles_post_ra>
